<compile_context>
chip_gen: v7x
topology: tpu7x:2x2x1
jax: 0.10.0
libtpu: 0.0.40
codegen_flags: <defaults>
</compile_context>

<pallas_src>
import jax
import jax.numpy as jnp
from jax.experimental import pallas as pl
from jax.experimental.pallas import tpu as pltpu


HID = 6   # fc1 out features
DIN = 4   # fc1 in features


def mlp_kernel(w1_ref, b1_ref, w2_ref, b2_ref, x_ref, o_ref):
    # w1_ref: SMEM f32[24]  (fc1.weight, row-major [6,4] flattened)
    # b1_ref: SMEM f32[6]
    # w2_ref: SMEM f32[6]   (fc2.weight flattened)
    # b2_ref: SMEM f32[1]
    # x_ref : VMEM f32[4, TB]   (batch on the lane axis)
    # o_ref : VMEM f32[1, TB]
    tb = o_ref.shape[-1]
    x = x_ref[...]                                   # [4, TB]

    y = jnp.full((1, tb), b2_ref[0], jnp.float32)    # start from fc2 bias
    for j in range(HID):                             # unrolled: 6 hidden units
        hj = jnp.full((1, tb), b1_ref[j], jnp.float32)
        for k in range(DIN):                         # unrolled: 24 FMAs total
            hj = hj + w1_ref[DIN * j + k] * x[k:k + 1, :]
        hj = jax.nn.sigmoid(hj)                      # EUP transcendental
        y = y + w2_ref[j] * hj                       # 6 more FMAs
    o_ref[...] = jax.nn.sigmoid(y).astype(o_ref.dtype)


def mlp_forward(x, w1, b1, w2, b2, *, tb=512):
    """x: [B, 4];  w1: [6, 4];  b1: [6];  w2: [1, 6];  b2: [1]  ->  [B, 1]."""
    B = x.shape[0]

    # Lane-major layout: batch on the last (lane) axis, padded to a tile multiple.
    n_tiles = pl.cdiv(B, tb)
    Bp = n_tiles * tb
    xt = jnp.pad(x.T.astype(jnp.float32), ((0, 0), (0, Bp - B)))   # [4, Bp]

    w1_flat = w1.reshape(-1).astype(jnp.float32)     # [24]
    b1_flat = b1.reshape(-1).astype(jnp.float32)     # [6]
    w2_flat = w2.reshape(-1).astype(jnp.float32)     # [6]
    b2_flat = b2.reshape(-1).astype(jnp.float32)     # [1]

    smem_spec = pl.BlockSpec(memory_space=pltpu.MemorySpace.SMEM)

    out = pl.pallas_call(
        mlp_kernel,
        out_shape=jax.ShapeDtypeStruct((1, Bp), jnp.float32),
        grid=(n_tiles,),
        in_specs=[
            smem_spec,                                        # w1 scalars
            smem_spec,                                        # b1 scalars
            smem_spec,                                        # w2 scalars
            smem_spec,                                        # b2 scalar
            pl.BlockSpec((DIN, tb), lambda i: (0, i)),        # x tile [4, TB]
        ],
        out_specs=pl.BlockSpec((1, tb), lambda i: (0, i)),    # lane-dense [1, TB]
        compiler_params=pltpu.CompilerParams(
            dimension_semantics=("parallel",),                # v7x: use both TCs
        ),
    )(w1_flat, b1_flat, w2_flat, b2_flat, xt)

    return out[:, :B].T                                       # [B, 1]


if __name__ == "__main__":
    key = jax.random.PRNGKey(0)
    k_x, k_w1, k_b1, k_w2, k_b2 = jax.random.split(key, 5)

    batch = 1024          # two 512-lane tiles -> pipelined, both-TC-friendly
    in_dim, hid_dim, out_dim = DIN, HID, 1

    x = jax.random.normal(k_x, (batch, in_dim), dtype=jnp.float32)

    # Deterministic parameter init (PyTorch Linear default-ish uniform range),
    # stored in PyTorch layout: weight[out, in], bias[out].
    bound1 = 1.0 / jnp.sqrt(in_dim)
    w1 = jax.random.uniform(k_w1, (hid_dim, in_dim), jnp.float32, -bound1, bound1)
    b1 = jax.random.uniform(k_b1, (hid_dim,), jnp.float32, -bound1, bound1)
    bound2 = 1.0 / jnp.sqrt(hid_dim)
    w2 = jax.random.uniform(k_w2, (out_dim, hid_dim), jnp.float32, -bound2, bound2)
    b2 = jax.random.uniform(k_b2, (out_dim,), jnp.float32, -bound2, bound2)

    out = mlp_forward(x, w1, b1, w2, b2)
    out = jax.block_until_ready(out)

    # Reference check in plain JAX (PyTorch semantics: x @ W.T + b).
    ref = jax.nn.sigmoid(jax.nn.sigmoid(x @ w1.T + b1) @ w2.T + b2)
    assert out.shape == (batch, out_dim)
    assert jnp.allclose(out, ref, atol=1e-5), "mismatch vs reference"

    print("KERNEL_OK")
</pallas_src>

<mosaic_0001>
module attributes {stable_mosaic.version = 11 : i64} {
  func.func @mlp_kernel(%arg0: i32, %arg1: memref<24xf32, #tpu.memory_space<smem>>, %arg2: memref<6xf32, #tpu.memory_space<smem>>, %arg3: memref<6xf32, #tpu.memory_space<smem>>, %arg4: memref<1xf32, #tpu.memory_space<smem>>, %arg5: memref<4x512xf32, #tpu.memory_space<vmem>>, %arg6: memref<1x512xf32, #tpu.memory_space<vmem>>) attributes {dimension_semantics = [#tpu.dimension_semantics<parallel>], iteration_bounds = array<i64: 2>, scalar_prefetch = 0 : i64, scratch_operands = 0 : i64, tpu.core_type = #tpu.core_type<tc>, window_params = [{transform_indices = @transform_0, window_bounds = array<i64: 24>}, {transform_indices = @transform_1, window_bounds = array<i64: 6>}, {transform_indices = @transform_2, window_bounds = array<i64: 6>}, {transform_indices = @transform_3, window_bounds = array<i64: 1>}, {transform_indices = @transform_4, window_bounds = array<i64: 4, 512>}, {transform_indices = @transform_5, window_bounds = array<i64: 1, 512>}]} {
    %c0 = arith.constant 0 : index
    %c0_0 = arith.constant 0 : index
    %0 = vector.load %arg5[%c0, %c0_0] : memref<4x512xf32, #tpu.memory_space<vmem>>, vector<4x512xf32>
    %c0_1 = arith.constant 0 : index
    %1 = memref.load %arg4[%c0_1] : memref<1xf32, #tpu.memory_space<smem>>
    %2 = vector.broadcast %1 : f32 to vector<1x512xf32>
    %c0_2 = arith.constant 0 : index
    %3 = memref.load %arg2[%c0_2] : memref<6xf32, #tpu.memory_space<smem>>
    %4 = vector.broadcast %3 : f32 to vector<1x512xf32>
    %c0_3 = arith.constant 0 : index
    %5 = memref.load %arg1[%c0_3] : memref<24xf32, #tpu.memory_space<smem>>
    %6 = vector.extract_strided_slice %0 {offsets = [0, 0], sizes = [1, 512], strides = [1, 1]} : vector<4x512xf32> to vector<1x512xf32>
    %7 = vector.broadcast %5 : f32 to vector<1x512xf32>
    %8 = arith.mulf %7, %6 : vector<1x512xf32>
    %9 = arith.addf %4, %8 : vector<1x512xf32>
    %c1 = arith.constant 1 : index
    %10 = memref.load %arg1[%c1] : memref<24xf32, #tpu.memory_space<smem>>
    %11 = vector.extract_strided_slice %0 {offsets = [1, 0], sizes = [1, 512], strides = [1, 1]} : vector<4x512xf32> to vector<1x512xf32>
    %12 = vector.broadcast %10 : f32 to vector<1x512xf32>
    %13 = arith.mulf %12, %11 : vector<1x512xf32>
    %14 = arith.addf %9, %13 : vector<1x512xf32>
    %c2 = arith.constant 2 : index
    %15 = memref.load %arg1[%c2] : memref<24xf32, #tpu.memory_space<smem>>
    %16 = vector.extract_strided_slice %0 {offsets = [2, 0], sizes = [1, 512], strides = [1, 1]} : vector<4x512xf32> to vector<1x512xf32>
    %17 = vector.broadcast %15 : f32 to vector<1x512xf32>
    %18 = arith.mulf %17, %16 : vector<1x512xf32>
    %19 = arith.addf %14, %18 : vector<1x512xf32>
    %c3 = arith.constant 3 : index
    %20 = memref.load %arg1[%c3] : memref<24xf32, #tpu.memory_space<smem>>
    %21 = vector.extract_strided_slice %0 {offsets = [3, 0], sizes = [1, 512], strides = [1, 1]} : vector<4x512xf32> to vector<1x512xf32>
    %22 = vector.broadcast %20 : f32 to vector<1x512xf32>
    %23 = arith.mulf %22, %21 : vector<1x512xf32>
    %24 = arith.addf %19, %23 : vector<1x512xf32>
    %25 = arith.negf %24 : vector<1x512xf32>
    %26 = math.exp %25 : vector<1x512xf32>
    %cst = arith.constant 1.000000e+00 : f32
    %27 = vector.broadcast %cst : f32 to vector<1x512xf32>
    %28 = arith.addf %27, %26 : vector<1x512xf32>
    %29 = arith.divf %27, %28 : vector<1x512xf32>
    %c0_4 = arith.constant 0 : index
    %30 = memref.load %arg3[%c0_4] : memref<6xf32, #tpu.memory_space<smem>>
    %31 = vector.broadcast %30 : f32 to vector<1x512xf32>
    %32 = arith.mulf %31, %29 : vector<1x512xf32>
    %33 = arith.addf %2, %32 : vector<1x512xf32>
    %c1_5 = arith.constant 1 : index
    %34 = memref.load %arg2[%c1_5] : memref<6xf32, #tpu.memory_space<smem>>
    %35 = vector.broadcast %34 : f32 to vector<1x512xf32>
    %c4 = arith.constant 4 : index
    %36 = memref.load %arg1[%c4] : memref<24xf32, #tpu.memory_space<smem>>
    %37 = vector.extract_strided_slice %0 {offsets = [0, 0], sizes = [1, 512], strides = [1, 1]} : vector<4x512xf32> to vector<1x512xf32>
    %38 = vector.broadcast %36 : f32 to vector<1x512xf32>
    %39 = arith.mulf %38, %37 : vector<1x512xf32>
    %40 = arith.addf %35, %39 : vector<1x512xf32>
    %c5 = arith.constant 5 : index
    %41 = memref.load %arg1[%c5] : memref<24xf32, #tpu.memory_space<smem>>
    %42 = vector.extract_strided_slice %0 {offsets = [1, 0], sizes = [1, 512], strides = [1, 1]} : vector<4x512xf32> to vector<1x512xf32>
    %43 = vector.broadcast %41 : f32 to vector<1x512xf32>
    %44 = arith.mulf %43, %42 : vector<1x512xf32>
    %45 = arith.addf %40, %44 : vector<1x512xf32>
    %c6 = arith.constant 6 : index
    %46 = memref.load %arg1[%c6] : memref<24xf32, #tpu.memory_space<smem>>
    %47 = vector.extract_strided_slice %0 {offsets = [2, 0], sizes = [1, 512], strides = [1, 1]} : vector<4x512xf32> to vector<1x512xf32>
    %48 = vector.broadcast %46 : f32 to vector<1x512xf32>
    %49 = arith.mulf %48, %47 : vector<1x512xf32>
    %50 = arith.addf %45, %49 : vector<1x512xf32>
    %c7 = arith.constant 7 : index
    %51 = memref.load %arg1[%c7] : memref<24xf32, #tpu.memory_space<smem>>
    %52 = vector.extract_strided_slice %0 {offsets = [3, 0], sizes = [1, 512], strides = [1, 1]} : vector<4x512xf32> to vector<1x512xf32>
    %53 = vector.broadcast %51 : f32 to vector<1x512xf32>
    %54 = arith.mulf %53, %52 : vector<1x512xf32>
    %55 = arith.addf %50, %54 : vector<1x512xf32>
    %56 = arith.negf %55 : vector<1x512xf32>
    %57 = math.exp %56 : vector<1x512xf32>
    %cst_6 = arith.constant 1.000000e+00 : f32
    %58 = vector.broadcast %cst_6 : f32 to vector<1x512xf32>
    %59 = arith.addf %58, %57 : vector<1x512xf32>
    %60 = arith.divf %58, %59 : vector<1x512xf32>
    %c1_7 = arith.constant 1 : index
    %61 = memref.load %arg3[%c1_7] : memref<6xf32, #tpu.memory_space<smem>>
    %62 = vector.broadcast %61 : f32 to vector<1x512xf32>
    %63 = arith.mulf %62, %60 : vector<1x512xf32>
    %64 = arith.addf %33, %63 : vector<1x512xf32>
    %c2_8 = arith.constant 2 : index
    %65 = memref.load %arg2[%c2_8] : memref<6xf32, #tpu.memory_space<smem>>
    %66 = vector.broadcast %65 : f32 to vector<1x512xf32>
    %c8 = arith.constant 8 : index
    %67 = memref.load %arg1[%c8] : memref<24xf32, #tpu.memory_space<smem>>
    %68 = vector.extract_strided_slice %0 {offsets = [0, 0], sizes = [1, 512], strides = [1, 1]} : vector<4x512xf32> to vector<1x512xf32>
    %69 = vector.broadcast %67 : f32 to vector<1x512xf32>
    %70 = arith.mulf %69, %68 : vector<1x512xf32>
    %71 = arith.addf %66, %70 : vector<1x512xf32>
    %c9 = arith.constant 9 : index
    %72 = memref.load %arg1[%c9] : memref<24xf32, #tpu.memory_space<smem>>
    %73 = vector.extract_strided_slice %0 {offsets = [1, 0], sizes = [1, 512], strides = [1, 1]} : vector<4x512xf32> to vector<1x512xf32>
    %74 = vector.broadcast %72 : f32 to vector<1x512xf32>
    %75 = arith.mulf %74, %73 : vector<1x512xf32>
    %76 = arith.addf %71, %75 : vector<1x512xf32>
    %c10 = arith.constant 10 : index
    %77 = memref.load %arg1[%c10] : memref<24xf32, #tpu.memory_space<smem>>
    %78 = vector.extract_strided_slice %0 {offsets = [2, 0], sizes = [1, 512], strides = [1, 1]} : vector<4x512xf32> to vector<1x512xf32>
    %79 = vector.broadcast %77 : f32 to vector<1x512xf32>
    %80 = arith.mulf %79, %78 : vector<1x512xf32>
    %81 = arith.addf %76, %80 : vector<1x512xf32>
    %c11 = arith.constant 11 : index
    %82 = memref.load %arg1[%c11] : memref<24xf32, #tpu.memory_space<smem>>
    %83 = vector.extract_strided_slice %0 {offsets = [3, 0], sizes = [1, 512], strides = [1, 1]} : vector<4x512xf32> to vector<1x512xf32>
    %84 = vector.broadcast %82 : f32 to vector<1x512xf32>
    %85 = arith.mulf %84, %83 : vector<1x512xf32>
    %86 = arith.addf %81, %85 : vector<1x512xf32>
    %87 = arith.negf %86 : vector<1x512xf32>
    %88 = math.exp %87 : vector<1x512xf32>
    %cst_9 = arith.constant 1.000000e+00 : f32
    %89 = vector.broadcast %cst_9 : f32 to vector<1x512xf32>
    %90 = arith.addf %89, %88 : vector<1x512xf32>
    %91 = arith.divf %89, %90 : vector<1x512xf32>
    %c2_10 = arith.constant 2 : index
    %92 = memref.load %arg3[%c2_10] : memref<6xf32, #tpu.memory_space<smem>>
    %93 = vector.broadcast %92 : f32 to vector<1x512xf32>
    %94 = arith.mulf %93, %91 : vector<1x512xf32>
    %95 = arith.addf %64, %94 : vector<1x512xf32>
    %c3_11 = arith.constant 3 : index
    %96 = memref.load %arg2[%c3_11] : memref<6xf32, #tpu.memory_space<smem>>
    %97 = vector.broadcast %96 : f32 to vector<1x512xf32>
    %c12 = arith.constant 12 : index
    %98 = memref.load %arg1[%c12] : memref<24xf32, #tpu.memory_space<smem>>
    %99 = vector.extract_strided_slice %0 {offsets = [0, 0], sizes = [1, 512], strides = [1, 1]} : vector<4x512xf32> to vector<1x512xf32>
    %100 = vector.broadcast %98 : f32 to vector<1x512xf32>
    %101 = arith.mulf %100, %99 : vector<1x512xf32>
    %102 = arith.addf %97, %101 : vector<1x512xf32>
    %c13 = arith.constant 13 : index
    %103 = memref.load %arg1[%c13] : memref<24xf32, #tpu.memory_space<smem>>
    %104 = vector.extract_strided_slice %0 {offsets = [1, 0], sizes = [1, 512], strides = [1, 1]} : vector<4x512xf32> to vector<1x512xf32>
    %105 = vector.broadcast %103 : f32 to vector<1x512xf32>
    %106 = arith.mulf %105, %104 : vector<1x512xf32>
    %107 = arith.addf %102, %106 : vector<1x512xf32>
    %c14 = arith.constant 14 : index
    %108 = memref.load %arg1[%c14] : memref<24xf32, #tpu.memory_space<smem>>
    %109 = vector.extract_strided_slice %0 {offsets = [2, 0], sizes = [1, 512], strides = [1, 1]} : vector<4x512xf32> to vector<1x512xf32>
    %110 = vector.broadcast %108 : f32 to vector<1x512xf32>
    %111 = arith.mulf %110, %109 : vector<1x512xf32>
    %112 = arith.addf %107, %111 : vector<1x512xf32>
    %c15 = arith.constant 15 : index
    %113 = memref.load %arg1[%c15] : memref<24xf32, #tpu.memory_space<smem>>
    %114 = vector.extract_strided_slice %0 {offsets = [3, 0], sizes = [1, 512], strides = [1, 1]} : vector<4x512xf32> to vector<1x512xf32>
    %115 = vector.broadcast %113 : f32 to vector<1x512xf32>
    %116 = arith.mulf %115, %114 : vector<1x512xf32>
    %117 = arith.addf %112, %116 : vector<1x512xf32>
    %118 = arith.negf %117 : vector<1x512xf32>
    %119 = math.exp %118 : vector<1x512xf32>
    %cst_12 = arith.constant 1.000000e+00 : f32
    %120 = vector.broadcast %cst_12 : f32 to vector<1x512xf32>
    %121 = arith.addf %120, %119 : vector<1x512xf32>
    %122 = arith.divf %120, %121 : vector<1x512xf32>
    %c3_13 = arith.constant 3 : index
    %123 = memref.load %arg3[%c3_13] : memref<6xf32, #tpu.memory_space<smem>>
    %124 = vector.broadcast %123 : f32 to vector<1x512xf32>
    %125 = arith.mulf %124, %122 : vector<1x512xf32>
    %126 = arith.addf %95, %125 : vector<1x512xf32>
    %c4_14 = arith.constant 4 : index
    %127 = memref.load %arg2[%c4_14] : memref<6xf32, #tpu.memory_space<smem>>
    %128 = vector.broadcast %127 : f32 to vector<1x512xf32>
    %c16 = arith.constant 16 : index
    %129 = memref.load %arg1[%c16] : memref<24xf32, #tpu.memory_space<smem>>
    %130 = vector.extract_strided_slice %0 {offsets = [0, 0], sizes = [1, 512], strides = [1, 1]} : vector<4x512xf32> to vector<1x512xf32>
    %131 = vector.broadcast %129 : f32 to vector<1x512xf32>
    %132 = arith.mulf %131, %130 : vector<1x512xf32>
    %133 = arith.addf %128, %132 : vector<1x512xf32>
    %c17 = arith.constant 17 : index
    %134 = memref.load %arg1[%c17] : memref<24xf32, #tpu.memory_space<smem>>
    %135 = vector.extract_strided_slice %0 {offsets = [1, 0], sizes = [1, 512], strides = [1, 1]} : vector<4x512xf32> to vector<1x512xf32>
    %136 = vector.broadcast %134 : f32 to vector<1x512xf32>
    %137 = arith.mulf %136, %135 : vector<1x512xf32>
    %138 = arith.addf %133, %137 : vector<1x512xf32>
    %c18 = arith.constant 18 : index
    %139 = memref.load %arg1[%c18] : memref<24xf32, #tpu.memory_space<smem>>
    %140 = vector.extract_strided_slice %0 {offsets = [2, 0], sizes = [1, 512], strides = [1, 1]} : vector<4x512xf32> to vector<1x512xf32>
    %141 = vector.broadcast %139 : f32 to vector<1x512xf32>
    %142 = arith.mulf %141, %140 : vector<1x512xf32>
    %143 = arith.addf %138, %142 : vector<1x512xf32>
    %c19 = arith.constant 19 : index
    %144 = memref.load %arg1[%c19] : memref<24xf32, #tpu.memory_space<smem>>
    %145 = vector.extract_strided_slice %0 {offsets = [3, 0], sizes = [1, 512], strides = [1, 1]} : vector<4x512xf32> to vector<1x512xf32>
    %146 = vector.broadcast %144 : f32 to vector<1x512xf32>
    %147 = arith.mulf %146, %145 : vector<1x512xf32>
    %148 = arith.addf %143, %147 : vector<1x512xf32>
    %149 = arith.negf %148 : vector<1x512xf32>
    %150 = math.exp %149 : vector<1x512xf32>
    %cst_15 = arith.constant 1.000000e+00 : f32
    %151 = vector.broadcast %cst_15 : f32 to vector<1x512xf32>
    %152 = arith.addf %151, %150 : vector<1x512xf32>
    %153 = arith.divf %151, %152 : vector<1x512xf32>
    %c4_16 = arith.constant 4 : index
    %154 = memref.load %arg3[%c4_16] : memref<6xf32, #tpu.memory_space<smem>>
    %155 = vector.broadcast %154 : f32 to vector<1x512xf32>
    %156 = arith.mulf %155, %153 : vector<1x512xf32>
    %157 = arith.addf %126, %156 : vector<1x512xf32>
    %c5_17 = arith.constant 5 : index
    %158 = memref.load %arg2[%c5_17] : memref<6xf32, #tpu.memory_space<smem>>
    %159 = vector.broadcast %158 : f32 to vector<1x512xf32>
    %c20 = arith.constant 20 : index
    %160 = memref.load %arg1[%c20] : memref<24xf32, #tpu.memory_space<smem>>
    %161 = vector.extract_strided_slice %0 {offsets = [0, 0], sizes = [1, 512], strides = [1, 1]} : vector<4x512xf32> to vector<1x512xf32>
    %162 = vector.broadcast %160 : f32 to vector<1x512xf32>
    %163 = arith.mulf %162, %161 : vector<1x512xf32>
    %164 = arith.addf %159, %163 : vector<1x512xf32>
    %c21 = arith.constant 21 : index
    %165 = memref.load %arg1[%c21] : memref<24xf32, #tpu.memory_space<smem>>
    %166 = vector.extract_strided_slice %0 {offsets = [1, 0], sizes = [1, 512], strides = [1, 1]} : vector<4x512xf32> to vector<1x512xf32>
    %167 = vector.broadcast %165 : f32 to vector<1x512xf32>
    %168 = arith.mulf %167, %166 : vector<1x512xf32>
    %169 = arith.addf %164, %168 : vector<1x512xf32>
    %c22 = arith.constant 22 : index
    %170 = memref.load %arg1[%c22] : memref<24xf32, #tpu.memory_space<smem>>
    %171 = vector.extract_strided_slice %0 {offsets = [2, 0], sizes = [1, 512], strides = [1, 1]} : vector<4x512xf32> to vector<1x512xf32>
    %172 = vector.broadcast %170 : f32 to vector<1x512xf32>
    %173 = arith.mulf %172, %171 : vector<1x512xf32>
    %174 = arith.addf %169, %173 : vector<1x512xf32>
    %c23 = arith.constant 23 : index
    %175 = memref.load %arg1[%c23] : memref<24xf32, #tpu.memory_space<smem>>
    %176 = vector.extract_strided_slice %0 {offsets = [3, 0], sizes = [1, 512], strides = [1, 1]} : vector<4x512xf32> to vector<1x512xf32>
    %177 = vector.broadcast %175 : f32 to vector<1x512xf32>
    %178 = arith.mulf %177, %176 : vector<1x512xf32>
    %179 = arith.addf %174, %178 : vector<1x512xf32>
    %180 = arith.negf %179 : vector<1x512xf32>
    %181 = math.exp %180 : vector<1x512xf32>
    %cst_18 = arith.constant 1.000000e+00 : f32
    %182 = vector.broadcast %cst_18 : f32 to vector<1x512xf32>
    %183 = arith.addf %182, %181 : vector<1x512xf32>
    %184 = arith.divf %182, %183 : vector<1x512xf32>
    %c5_19 = arith.constant 5 : index
    %185 = memref.load %arg3[%c5_19] : memref<6xf32, #tpu.memory_space<smem>>
    %186 = vector.broadcast %185 : f32 to vector<1x512xf32>
    %187 = arith.mulf %186, %184 : vector<1x512xf32>
    %188 = arith.addf %157, %187 : vector<1x512xf32>
    %189 = arith.negf %188 : vector<1x512xf32>
    %190 = math.exp %189 : vector<1x512xf32>
    %cst_20 = arith.constant 1.000000e+00 : f32
    %191 = vector.broadcast %cst_20 : f32 to vector<1x512xf32>
    %192 = arith.addf %191, %190 : vector<1x512xf32>
    %193 = arith.divf %191, %192 : vector<1x512xf32>
    %c0_21 = arith.constant 0 : index
    %c0_22 = arith.constant 0 : index
    %194 = vector.load %arg6[%c0_21, %c0_22] : memref<1x512xf32, #tpu.memory_space<vmem>>, vector<1x512xf32>
    tpu.vector_store %arg6[%c0_21, %c0_22], %193 {strides = array<i32>} : memref<1x512xf32, #tpu.memory_space<vmem>>, vector<1x512xf32>,
    return
  }
  func.func @transform_0(%arg0: i32) -> i32 {
    %c0_i32 = arith.constant 0 : i32
    %c0_i32_0 = arith.constant 0 : i32
    return %c0_i32 : i32
  }
  func.func @transform_1(%arg0: i32) -> i32 {
    %c0_i32 = arith.constant 0 : i32
    %c0_i32_0 = arith.constant 0 : i32
    return %c0_i32 : i32
  }
  func.func @transform_2(%arg0: i32) -> i32 {
    %c0_i32 = arith.constant 0 : i32
    %c0_i32_0 = arith.constant 0 : i32
    return %c0_i32 : i32
  }
  func.func @transform_3(%arg0: i32) -> i32 {
    %c0_i32 = arith.constant 0 : i32
    %c0_i32_0 = arith.constant 0 : i32
    return %c0_i32 : i32
  }
  func.func @transform_4(%arg0: i32) -> (i32, i32) {
    %c0_i32 = arith.constant 0 : i32
    %c0_i32_0 = arith.constant 0 : i32
    return %c0_i32, %arg0 : i32, i32
  }
  func.func @transform_5(%arg0: i32) -> (i32, i32) {
    %c0_i32 = arith.constant 0 : i32
    %c0_i32_0 = arith.constant 0 : i32
    return %c0_i32, %arg0 : i32, i32
  }
}

</mosaic_0001>

<bundles_post_ra>
// kernel: tpu_custom_call.1
= control target key start
LH: loop header
LB: loop body
LE: loop exit
PB: predicated region body
PF: predicated region fallthrough
CT: control target
= control target key end

     0   :  { %s1632_s0 = inlined_call_operand.vmem [shape: f32[24], index: 0, kind: input, shape index: {}]   ;;  %s1633_s1 = inlined_call_operand.vmem [shape: f32[6], index: 1, kind: input, shape index: {}]   ;;  %s1634_s2 = inlined_call_operand.vmem [shape: f32[6], index: 2, kind: input, shape index: {}]   ;;  %s1635_s3 = inlined_call_operand.<no memory space> [shape: f32[1], index: 3, kind: input, shape index: {}]   ;;  %s1636_s4 = inlined_call_operand.hbm [shape: f32[4,1024], index: 4, kind: input, shape index: {}]   ;;  %s1637_s5 = inlined_call_operand.hbm [shape: f32[1,1024], index: 5, kind: output, shape index: {}]  }
   0x1   :  { %10 = sst [smem:[#allocation2]] %s1635_s3 }
   0x2   :  { %11 = vsyncpa [#allocation6], 0 }
   0x3   :  { %12 = vsyncpa [#allocation8], 0 }
   0x4   :  { %13 = vsyncpa [#allocation4], 0 }
   0x5   :  { %15 = vsyncpa [#allocation4 + $0x1], 0 }
   0x6   :  { %16 = vsyncpa [#allocation5], 0 }
   0x7   :  { %18 = vsyncpa [#allocation5 + $0x1], 0  ;;  %s1282_s20 = smov 0   ;;  %s1284_s21 = smov 0  }
   0x8   :  { %s1286_s22 = smov 0   ;;  %s1288_s23 = smov 0  }
   0x9 LB: > { %s1303_s3 = sadd.s32 4294967295, %s1241_s23   ;;  %s853_s24 = sadd.s32 4294967294, %s1241_s23   ;;  %s1241_s23 = sphi %s1288_s23, %s1659_s23   ;;  %s1237_s22 = sphi %s1286_s22, %s1658_s22   ;;  %s1233_s21 = sphi %s1284_s21, %s1657_s21   ;;  %s1229_s20 = sphi %s1282_s20, %s1656_s20  }
   0xa   : > { %p128_p0 = scmp.ne.s32.totalorder %s1233_s21, %s1229_s20  ;;  %p1638_p1 = scmp.eq.s32.totalorder %s1303_s3, 0 }
   0xb   : > { %p158_p3 = scmp.eq.s32.totalorder %s853_s24, 1  ;;  %p854_p5 = scmp.ge.s32.totalorder %s1241_s23, 1 }
   0xc   : > { %p1312_p4 = por %p1638_p1, %p128_p0  ;;  %p165_p7 = scmp.lt.s32.totalorder %s1241_s23, 3 }
   0xd   : > { %p1317_p6 = por %p158_p3, %p128_p0  ;;  %s189_s29 = sshll.u32 %s1633_s1, 4  ;;  %s190_s29 = int_to_ptr.vmem [resolvable:$true] %s189_s29 }
   0xe   : > { %s1641_s25 = scalar_select %p1312_p4, 1, 0 }
   0xf   : > { %s1642_s26 = scalar_select %p1317_p6, 1, 0 }
  0x10   : > { %p1325_p8 = pnand %p854_p5, %p165_p7  ;;  %s178_s8 = sshll.u32 %s1632_s0, 4  ;;  %s179_s8 = int_to_ptr.vmem [resolvable:$true] %s178_s8 }
  0x11   : > { %s200_s12 = sshll.u32 %s1634_s2, 4  ;;  %s1092_s13 = scalar_lea.vmem %s190_s29, 16  ;;  %s1344_s12 = int_to_ptr.vmem [resolvable:$true] %s200_s12 }
  0x12   : > { %s1643_s30 = scalar_select %p1325_p8, 1, 0 }
  0x13   : > { %p974_p10 = pneg %p1325_p8  ;;  %p1093_p12 = scmp.ne.s32.totalorder %s190_s29, %s1092_s13 }
  0x14   : > { %p1100_p5 = scmp.lt.s32.totalorder %s190_s29, %s190_s29  ;;  %p1101_p7 = scmp.lt.s32.totalorder %s1092_s13, %s1092_s13 }
  0x15   : > { %p1337_p11 = pnand %p974_p10, %p1638_p1 }
  0x16   : > { %p1102_p10 = por %p1101_p7, %p1100_p5 }
  0x17   : > { %p1094_p13 = pneg %p1337_p11 }
  0x19   : > { %p1095_p0 = pnand %p1094_p13, %p1093_p12 }
  0x1b   : > { %p1096_p3 = pneg %p1095_p0 }
  0x1d   : > { %p1103_p9 = pnand %p1102_p10, %p1096_p3 }
  0x1f   : > { %1106 = shalt.err (!%p1103_p9)
}
  0x20   : > { %s1243_s14 = smov [#allocation7]   ;;  %s1107_s15 = scalar_lea.vmem %s179_s8, 16 }
  0x21   : > { %980 = dma.vmem_to_smem (!%p1337_p11), %s190_s29, 16, %s1243_s14, [#allocation8]  }
  0x22   : > { %p1108_p1 = scmp.ne.s32.totalorder %s179_s8, %s1107_s15  ;;  %p1115_p4 = scmp.lt.s32.totalorder %s179_s8, %s179_s8 }
  0x23   : > { %p1116_p8 = scmp.lt.s32.totalorder %s1107_s15, %s1107_s15 }
  0x24   : > { %p1110_p2 = pnand %p1108_p1, %p1094_p13 }
  0x25   : > { %p1117_p12 = por %p1116_p8, %p1115_p4 }
  0x26   : > { %p1111_p6 = pneg %p1110_p2 }
  0x28   : > { %p1118_p0 = pnand %p1117_p12, %p1111_p6 }
  0x2a   : > { %1121 = shalt.err (!%p1118_p0)
}
  0x2b   : > { %s1244_s16 = smov [#allocation3]   ;;  %s1122_s17 = scalar_lea.vmem %s1344_s12, 16 }
  0x2c   : > { %977 = dma.vmem_to_smem (!%p1337_p11), %s179_s8, 16, %s1244_s16, [#allocation6]  }
  0x2d   : > { %p1123_p9 = scmp.ne.s32.totalorder %s1344_s12, %s1122_s17  ;;  %p1130_p2 = scmp.lt.s32.totalorder %s1344_s12, %s1344_s12 }
  0x2e   : > { %p1131_p5 = scmp.lt.s32.totalorder %s1122_s17, %s1122_s17 }
  0x2f   : > { %p1125_p3 = pnand %p1123_p9, %p1094_p13 }
  0x30   : > { %p1132_p4 = por %p1131_p5, %p1130_p2 }
  0x31   : > { %p1126_p1 = pneg %p1125_p3 }
  0x33   : > { %p1133_p6 = pnand %p1132_p4, %p1126_p1 }
  0x35   : > { %1136 = shalt.err (!%p1133_p6)
}
  0x36   : > { %s1245_s18 = smov [#allocation9]   ;;  %s1369_s19 = sadd.s32 1, %s1241_s23  }
  0x37   : > { %983 = dma.vmem_to_smem (!%p1337_p11), %s1344_s12, 16, %s1245_s18, [#allocation8]  }
  0x38   : > { %s112_s24 = ssub.s32 %s1241_s23, %s1369_s19  ;;  %s115_s27 = sadd.s32 1, %s1237_s22 }
  0x39   : > { %p113_p8 = scmp.eq.s32.totalorder %s112_s24, 0  ;;  %p122_p13 = scmp.ne.s32.totalorder %s1237_s22, %s1233_s21 }
  0x3a   : > { %p123_p7 = scmp.eq.s32.totalorder %s1241_s23, 0  ;;  %p995_p10 = scmp.lt.s32.totalorder %s1241_s23, 2 }
  0x3b   : > { %s1379_s28 = scalar_select %p113_p8, %s1237_s22, %s115_s27  }
  0x3c   : > { %p124_p12 = por %p123_p7, %p122_p13  ;;  %p1645_p0 = scmp.eq.s32.totalorder %s1303_s3, 1 }
  0x3d   : > { %s214_s6 = sand.u32 1, %s1237_s22   ;;  %s956_s7 = sshll.u32 %s1241_s23, 8 }
  0x3e   : > { %p1383_p9 = por %p1645_p0, %p122_p13  ;;  %s859_s8 = sshll.u32 %s214_s6, 4 }
  0x3f   : > { %s1392_s11 = scalar_lea.hbm %s1636_s4, %s956_s7  ;;  %s218_s12 = scalar_lea.vmem [#allocation10], %s859_s8 }
  0x40   : > { %s226_s13 = sshll.u32 %s218_s12, 4  ;;  %p1394_p11 = pnand %p995_p10, %p124_p12  ;;  %s1398_s13 = int_to_ptr.vmem [resolvable:$true] %s226_s13 }
  0x41   : > { %s215_s15 = scalar_lea.sflag [#allocation4], %s214_s6  ;;  %s1137_s16 = scalar_lea.hbm %s1392_s11, 256 }
  0x42   : > { %p1138_p3 = scmp.ne.s32.totalorder %s1392_s11, %s1137_s16  ;;  %p1139_p1 = pneg %p1394_p11 }
  0x43   : > { %s1142_s24 = scalar_lea.hbm %s1636_s4, 512  ;;  %p1143_p4 = scmp.lt.u32.totalorder %s1392_s11, %s1636_s4 }
  0x44   : > { %p1140_p2 = pnand %p1139_p1, %p1138_p3  ;;  %p1144_p6 = scmp.lt.u32.totalorder %s1142_s24, %s1137_s16 }
  0x45   : > { %p1146_p13 = scmp.lt.u32.totalorder %s1137_s16, %s1392_s11 }
  0x46   : > { %p1141_p5 = pneg %p1140_p2  ;;  %p1145_p8 = por %p1144_p6, %p1143_p4 }
  0x48   : > { %p1147_p7 = por %p1146_p13, %p1145_p8 }
  0x4a   : > { %p1148_p10 = pnand %p1147_p7, %p1141_p5 }
  0x4c   : > { %1151 = shalt.err (!%p1148_p10)
}
  0x4d   : > { %s1152_s6 = scalar_lea.vmem %s1398_s13, 256  ;;  %s1246_s8 = smov [#allocation10]  }
  0x4e   : > { %p1153_p12 = scmp.ne.s32.totalorder %s1398_s13, %s1152_s6  ;;  %s1157_s9 = sshll.u32 %s1246_s8, 4  ;;  %s1158_s9 = int_to_ptr.vmem [resolvable:$false] %s1157_s9 }
  0x4f   : > { %s1159_s10 = scalar_lea.vmem %s1158_s9, 512  ;;  %p1160_p2 = scmp.lt.s32.totalorder %s1398_s13, %s1158_s9 }
  0x50   : > { %p1155_p0 = pnand %p1153_p12, %p1139_p1  ;;  %p1161_p4 = scmp.lt.s32.totalorder %s1159_s10, %s1152_s6 }
  0x52   : > { %p1156_p3 = pneg %p1155_p0  ;;  %p1162_p6 = por %p1161_p4, %p1160_p2 }
  0x54   : > { %p1163_p8 = pnand %p1162_p6, %p1156_p3 }
  0x56   : > { %1166 = shalt.err (!%p1163_p8)
}
  0x57   : > { %987 = dma.hbm_to_vmem [thread:$0]  (!%p1394_p11), %s1392_s11, 256, %s1398_s13, %s215_s15  }
  0x58   : > { %p1648_p5 = scmp.ne.s32.totalorder %s1643_s30, 0 }
  0x59   : > { %p1649_p1 = scmp.eq.s32.totalorder (!%p1648_p5), %s1303_s3, 0 }
  0x5a   : > { %235 = sbr.rel (%p1648_p5) target bundleno = 241 (0xf1), region = 40 }
  0x61   : > { %1212 = dma.done.wait (%p1649_p1), [#allocation6], 16   ;;  %p1650_p13 = pmov %p1649_p1 }
  0x62   : > { %p1651_p7 = pmov %p1649_p1 }
  0x63   : > { %1214 = vsyncadd (%p1650_p13), [#allocation6], 4294967280 }
  0x64   : > { %1216 = dma.done.wait (%p1651_p7), [#allocation8], 32   ;;  %p1652_p10 = pmov %p1649_p1 }
  0x65   : > { %s1436_s12 = sand.u32 1, %s1233_s21   ;;  %p1653_p11 = scmp.ne.s32.totalorder %s1641_s25, 0 }
  0x66   : > { %1218 = vsyncadd (%p1652_p10), [#allocation8], 4294967264  ;;  %s866_s30 = sshll.u32 %s1436_s12, 4  ;;  %s250_s11 = scalar_lea.sflag [#allocation4], %s1436_s12 }
  0x67   : > { %s253_s13 = scalar_lea.vmem [#allocation10], %s866_s30 }
  0x68   : > { %1220 = dma.done.wait (%p1653_p11), %s250_s11, 256  }
  0x69   : > { %1222 = vsyncadd (%p1653_p11), %s250_s11, 4294967040 }
  0x6a   : > { %258 = sfence }
  0x6b   : > { %s287_s14 = sld [smem:[#allocation7]]  ;;  %s868_s16 = sld [smem:[#allocation3 + $0x1]]  ;;  %v1448_v0 = vld [vmem:[%s253_s13] sm:$0xff]  ;;  %v1450_v1 = vld [vmem:[%s253_s13 + $0x8] sm:$0xff] }
  0x6c   : > { %s289_s15 = sld [smem:[#allocation3]]  ;;  %s871_s17 = sld [smem:[#allocation3 + $0x2]] }
  0x6d   : > { %s874_s18 = sld [smem:[#allocation3 + $0x3]]  ;;  %s1444_s24 = sld [smem:[#allocation3 + $0x4]] }
  0x6e   : > { %s1446_s27 = sld [smem:[#allocation3 + $0x5]]  ;;  %s1452_s7 = sld [smem:[#allocation7 + $0x1]] }
  0x6f   : > { %s1454_s25 = sld [smem:[#allocation3 + $0x6]]  ;;  %s1460_s6 = sld [smem:[#allocation3 + $0x7]] }
  0x70   : > { %s1469_s8 = sld [smem:[#allocation7 + $0x2]]  ;;  %s1471_s9 = sld [smem:[#allocation3 + $0x8]] }
  0x71   : > { %v288_v2 = vstv %s287_s14  ;;  %v296_v4 = vstv %s868_s16  ;;  %s1477_s10 = sld [smem:[#allocation3 + $0x9]]  ;;  %s1480_s30 = sld [smem:[#allocation3 + $0xa]] }
  0x72   : > { %v290_v3 = vstv %s289_s15  ;;  %v297_v7 = vmul.f32 %v296_v4, %v1448_v0  ;;  %v298_v8 = vmul.f32 %v296_v4, %v1450_v1  ;;  %v310_v9 = vstv %s871_s17  ;;  %s1482_s11 = sld [smem:[#allocation3 + $0xb]]  ;;  %s1493_s14 = sld [smem:[#allocation3 + $0xc]] }
  0x73   : > { %v291_v5 = vmul.f32 %v290_v3, %v1448_v0  ;;  %v292_v6 = vmul.f32 %v290_v3, %v1450_v1  ;;  %v324_v12 = vstv %s874_s18  ;;  %v311_v15 = vmul.f32 %v310_v9, %v1448_v0  ;;  %s1488_s13 = sld [smem:[#allocation7 + $0x3]]  ;;  %s1495_s15 = sld [smem:[#allocation3 + $0xd]] }
  0x74   : > { %v869_v11 = vrot.slane %v297_v7, 9  ;;  %v870_v14 = vrot.slane %v298_v8, 9  ;;  %v312_v16 = vmul.f32 %v310_v9, %v1450_v1  ;;  %v358_v17 = vstv %s1444_s24  ;;  %s1502_s16 = sld [smem:[#allocation3 + $0xe]]  ;;  %s1506_s17 = sld [smem:[#allocation3 + $0xf]] }
  0x75   : > { %v293_v10 = vadd.f32 %v291_v5, %v288_v2  ;;  %v294_v13 = vadd.f32 %v292_v6, %v288_v2  ;;  %v364_v18 = vstv %s1446_s27  ;;  %v325_v20 = vmul.f32 %v324_v12, %v1448_v0  ;;  %s1517_s18 = sld [smem:[#allocation7 + $0x4]]  ;;  %s1522_s24 = sld [smem:[#allocation3 + $0x10]] }
  0x76   : > { %v326_v21 = vmul.f32 %v324_v12, %v1450_v1  ;;  %v356_v22 = vstv %s1452_s7  ;;  %v359_v23 = vmul.f32 %v358_v17, %v1448_v0  ;;  %v360_v24 = vmul.f32 %v358_v17, %v1450_v1  ;;  %s1524_s27 = sld [smem:[#allocation3 + $0x11]]  ;;  %s1528_s7 = sld [smem:[#allocation3 + $0x12]] }
  0x77   : > { %v307_v19 = vadd.f32 %v869_v11, %v293_v10  ;;  %v365_v25 = vmul.f32 %v364_v18, %v1448_v0  ;;  %v366_v26 = vmul.f32 %v364_v18, %v1450_v1  ;;  %v308_v27 = vadd.f32 %v870_v14, %v294_v13 }
  0x78   : > { %v872_v28 = vrot.slane %v311_v15, 10  ;;  %v873_v29 = vrot.slane %v312_v16, 10  ;;  %v378_v30 = vstv %s1454_s25  ;;  %v361_v31 = vadd.f32 %v359_v23, %v356_v22  ;;  %s1533_s25 = sld [smem:[#allocation3 + $0x13]] }
  0x79   : > { %v362_v32 = vadd.f32 %v360_v24, %v356_v22  ;;  %v882_v33 = vrot.slane %v365_v25, 9  ;;  %v883_v34 = vrot.slane %v366_v26, 9  ;;  %v379_v35 = vmul.f32 %v378_v30, %v1448_v0 }
  0x7a   : > { %v392_v36 = vstv %s1460_s6  ;;  %v380_v37 = vmul.f32 %v378_v30, %v1450_v1  ;;  %v321_v38 = vadd.f32 %v872_v28, %v307_v19  ;;  %v322_v39 = vadd.f32 %v873_v29, %v308_v27  ;;  %s1542_s6 = sld [smem:[#allocation7 + $0x5]] }
  0x7b   : > { %v875_v40 = vrot.slane %v325_v20, 11  ;;  %v876_v41 = vrot.slane %v326_v21, 11  ;;  %v375_v42 = vadd.f32 %v882_v33, %v361_v31  ;;  %v376_v43 = vadd.f32 %v883_v34, %v362_v32 }
  0x7c   : > { %v393_v44 = vmul.f32 %v392_v36, %v1448_v0  ;;  %v885_v45 = vrot.slane %v379_v35, 10  ;;  %v394_v46 = vmul.f32 %v392_v36, %v1450_v1  ;;  %v424_v47 = vstv %s1469_s8  ;;  %s1544_s8 = sld [smem:[#allocation3 + $0x14]] }
  0x7d   : > { %v426_v48 = vstv %s1471_s9  ;;  %v886_v49 = vrot.slane %v380_v37, 10  ;;  %v432_v52 = vstv %s1477_s10  ;;  %v335_v53 = vadd.f32 %v875_v40, %v321_v38  ;;  %s1547_s9 = sld [smem:[#allocation3 + $0x15]]  ;;  %s1552_s10 = sld [smem:[#allocation3 + $0x16]] }
  0x7e   : > { %v427_v50 = vmul.f32 %v426_v48, %v1448_v0  ;;  %v428_v51 = vmul.f32 %v426_v48, %v1450_v1  ;;  %v336_v54 = vadd.f32 %v876_v41, %v322_v39  ;;  %v433_v55 = vmul.f32 %v432_v52, %v1448_v0 }
  0x7f   : > { %v434_v56 = vmul.f32 %v432_v52, %v1450_v1  ;;  %v446_v59 = vstv %s1480_s30  ;;  %v460_v60 = vstv %s1482_s11  ;;  %v888_v61 = vrot.slane %v393_v44, 11  ;;  %s1555_s30 = sld [smem:[#allocation3 + $0x17]]  ;;  %s1568_s11 = sld [smem:[#allocation9]] }
  0x80   : > { %v429_v57 = vadd.f32 %v427_v50, %v424_v47  ;;  %v430_v58 = vadd.f32 %v428_v51, %v424_v47  ;;  %v889_v62 = vrot.slane %v394_v46, 11  ;;  %v896_v63 = vrot.slane %v433_v55, 9 }
  0x81   : > { %v897_v2 = vrot.slane %v434_v56, 9  ;;  %v389_v3 = vadd.f32 %v885_v45, %v375_v42  ;;  %v390_v4 = vadd.f32 %v886_v49, %v376_v43  ;;  %v447_v5 = vmul.f32 %v446_v59, %v1448_v0 }
  0x82   : > { %v448_v6 = vmul.f32 %v446_v59, %v1450_v1  ;;  %v877_v7 = vmul.f32 -1.442695, %v335_v53  ;;  %v461_v8 = vmul.f32 %v460_v60, %v1448_v0  ;;  %v462_v9 = vmul.f32 %v460_v60, %v1450_v1 }
  0x83   : > { %v443_v10 = vadd.f32 %v896_v63, %v429_v57  ;;  %v444_v11 = vadd.f32 %v897_v2, %v430_v58  ;;  %v899_v12 = vrot.slane %v447_v5, 10  ;;  %v878_v14 = vmul.f32 -1.442695, %v336_v54 }
  0x84   : > { %v900_v13 = vrot.slane %v448_v6, 10  ;;  %v492_v15 = vstv %s1488_s13  ;;  %v494_v16 = vstv %s1493_s14  ;;  %v500_v17 = vstv %s1495_s15  ;;  %s1573_s13 = sld [smem:[#allocation2]]  ;;  %s1575_s14 = sld [smem:[#allocation9 + $0x1]] }
  0x85   : > { %v403_v18 = vadd.f32 %v888_v61, %v389_v3  ;;  %v404_v19 = vadd.f32 %v889_v62, %v390_v4  ;;  %v495_v20 = vmul.f32 %v494_v16, %v1448_v0  ;;  %v496_v21 = vmul.f32 %v494_v16, %v1450_v1  ;;  %s1578_s15 = sld [smem:[#allocation9 + $0x2]] }
  0x86   : > { %v902_v22 = vrot.slane %v461_v8, 11  ;;  %v501_v23 = vmul.f32 %v500_v17, %v1448_v0  ;;  %v502_v24 = vmul.f32 %v500_v17, %v1450_v1  ;;  %v514_v25 = vstv %s1502_s16  ;;  %s920_s16 = sld [smem:[#allocation9 + $0x3]] }
  0x87   : > { %v457_v26 = vadd.f32 %v899_v12, %v443_v10  ;;  %v458_v27 = vadd.f32 %v900_v13, %v444_v11  ;;  %v903_v28 = vrot.slane %v462_v9, 11  ;;  %v497_v29 = vadd.f32 %v495_v20, %v492_v15 }
  0x88   : > { %v498_v30 = vadd.f32 %v496_v21, %v492_v15  ;;  %v910_v31 = vrot.slane %v501_v23, 9  ;;  %v911_v32 = vrot.slane %v502_v24, 9  ;;  %v528_v33 = vstv %s1506_s17  ;;  %s934_s17 = sld [smem:[#allocation9 + $0x4]] }
  0x89   : > { %1036 = vpow2.f32 %v877_v7  ;;  %v890_v34 = vmul.f32 -1.442695, %v403_v18  ;;  %v515_v35 = vmul.f32 %v514_v25, %v1448_v0  ;;  %v516_v38 = vmul.f32 %v514_v25, %v1450_v1 }
  0x8a   : > { %1038 = vpow2.f32 %v878_v14  ;;  %v511_v36 = vadd.f32 %v910_v31, %v497_v29  ;;  %v512_v37 = vadd.f32 %v911_v32, %v498_v30  ;;  %v471_v39 = vadd.f32 %v902_v22, %v457_v26 }
  0x8b   : > { %v913_v40 = vrot.slane %v515_v35, 10  ;;  %v529_v41 = vmul.f32 %v528_v33, %v1448_v0  ;;  %v530_v42 = vmul.f32 %v528_v33, %v1450_v1  ;;  %v891_v43 = vmul.f32 -1.442695, %v404_v19 }
  0x8c   : > { %v472_v44 = vadd.f32 %v903_v28, %v458_v27  ;;  %v914_v45 = vrot.slane %v516_v38, 10  ;;  %1040 = vpow2.f32 %v890_v34  ;;  %v560_v50 = vstv %s1517_s18  ;;  %s948_s18 = sld [smem:[#allocation9 + $0x5]] }
  0x8d   : > { %v525_v46 = vadd.f32 %v913_v40, %v511_v36  ;;  %v916_v47 = vrot.slane %v529_v41, 11  ;;  %v917_v48 = vrot.slane %v530_v42, 11  ;;  %v562_v51 = vstv %s1522_s24  ;;  %s867_s24 = sshll.u32 %s1436_s12, 2 }
  0x8e   : > { %v526_v49 = vadd.f32 %v914_v45, %v512_v37  ;;  %v568_v52 = vstv %s1524_s27  ;;  %v904_v53 = vmul.f32 -1.442695, %v471_v39  ;;  %v563_v55 = vmul.f32 %v562_v51, %v1448_v0  ;;  %s957_s27 = sshll.u32 %s1303_s3, 6  ;;  %s1248_s3 = smov [#allocation11]  }
  0x8f   : > { %v539_v54 = vadd.f32 %v916_v47, %v525_v46  ;;  %v564_v56 = vmul.f32 %v562_v51, %v1450_v1  ;;  %1042 = vpow2.f32 %v891_v43  ;;  %v905_v57 = vmul.f32 -1.442695, %v472_v44 }
  0x90   : > { %v569_v58 = vmul.f32 %v568_v52, %v1448_v0  ;;  %v570_v59 = vmul.f32 %v568_v52, %v1450_v1  ;;  %v540_v60 = vadd.f32 %v917_v48, %v526_v49  ;;  %v565_v61 = vadd.f32 %v563_v55, %v560_v50 }
  0x91   : > { %v566_v62 = vadd.f32 %v564_v56, %v560_v50  ;;  %v582_v63 = vstv %s1528_s7  ;;  %v918_v2 = vmul.f32 -1.442695, %v539_v54  ;;  %1044 = vpow2.f32 %v904_v53  ;;  %s280_s7 = scalar_lea.vmem [#allocation11], %s867_s24 }
  0x92   : > { %v924_v3 = vrot.slane %v569_v58, 9  ;;  %v925_v4 = vrot.slane %v570_v59, 9  ;;  %v583_v5 = vmul.f32 %v582_v63, %v1448_v0  ;;  %v584_v7 = vmul.f32 %v582_v63, %v1450_v1 }
  0x93   : > { %v1037_v6 = vpop.eup %1036  ;;  %v596_v8 = vstv %s1533_s25  ;;  %1046 = vpow2.f32 %v905_v57  ;;  %v919_v12 = vmul.f32 -1.442695, %v540_v60  ;;  %v628_v24 = vstv %s1542_s6  ;;  %s752_s25 = sshll.u32 %s280_s7, 4  ;;  %s1590_s25 = int_to_ptr.vmem [resolvable:$true] %s752_s25 }
  0x94   : > { %v1039_v9 = vpop.eup %1038  ;;  %v579_v10 = vadd.f32 %v924_v3, %v565_v61  ;;  %v580_v11 = vadd.f32 %v925_v4, %v566_v62  ;;  %v927_v13 = vrot.slane %v583_v5, 10  ;;  %v928_v14 = vrot.slane %v584_v7, 10 }
  0x95   : > { %v597_v15 = vmul.f32 %v596_v8, %v1448_v0  ;;  %v343_v16 = vadd.f32 1.0, %v1037_v6  ;;  %1048 = vpow2.f32 %v918_v2  ;;  %v598_v17 = vmul.f32 %v596_v8, %v1450_v1 }
  0x96   : > { %v1041_v18 = vpop.eup %1040  ;;  %v344_v19 = vadd.f32 1.0, %v1039_v9  ;;  %v593_v20 = vadd.f32 %v927_v13, %v579_v10  ;;  %v594_v21 = vadd.f32 %v928_v14, %v580_v11  ;;  %v630_v25 = vstv %s1544_s8 }
  0x97   : > { %v930_v22 = vrot.slane %v597_v15, 11  ;;  %v931_v23 = vrot.slane %v598_v17, 11  ;;  %1050 = vpow2.f32 %v919_v12  ;;  %v631_v26 = vmul.f32 %v630_v25, %v1448_v0 }
  0x98   : > { %v632_v27 = vmul.f32 %v630_v25, %v1450_v1  ;;  %v636_v28 = vstv %s1547_s9  ;;  %1052 = vrcp.f32 %v343_v16  ;;  %v411_v36 = vadd.f32 1.0, %v1041_v18  ;;  %s1588_s9 = scalar_lea.hbm %s1637_s5, %s957_s27 }
  0x99   : > { %v1043_v29 = vpop.eup %1042  ;;  %v607_v30 = vadd.f32 %v930_v22, %v593_v20  ;;  %v608_v31 = vadd.f32 %v931_v23, %v594_v21  ;;  %v637_v32 = vmul.f32 %v636_v28, %v1448_v0  ;;  %1054 = vrcp.f32 %v344_v19 }
  0x9a   : > { %v633_v33 = vadd.f32 %v631_v26, %v628_v24  ;;  %v634_v34 = vadd.f32 %v632_v27, %v628_v24  ;;  %v638_v35 = vmul.f32 %v636_v28, %v1450_v1  ;;  %v412_v41 = vadd.f32 1.0, %v1043_v29 }
  0x9b   : > { %v932_v37 = vmul.f32 -1.442695, %v607_v30  ;;  %v933_v38 = vmul.f32 -1.442695, %v608_v31  ;;  %v938_v39 = vrot.slane %v637_v32, 9  ;;  %v1045_v40 = vpop.eup %1044  ;;  %v650_v43 = vstv %s1552_s10  ;;  %s738_s10 = scalar_lea.sflag [#allocation5], %s1436_s12 }
  0x9c   : > { %v939_v42 = vrot.slane %v638_v35, 9  ;;  %v664_v44 = vstv %s1555_s30  ;;  %v651_v47 = vmul.f32 %v650_v43, %v1448_v0  ;;  %v652_v49 = vmul.f32 %v650_v43, %v1450_v1  ;;  %s1167_s30 = scalar_lea.vmem %s1590_s25, 64 }
  0x9d   : > { %v1047_v45 = vpop.eup %1046  ;;  %1056 = vpow2.f32 %v932_v37  ;;  %v647_v46 = vadd.f32 %v938_v39, %v633_v33  ;;  %v665_v52 = vmul.f32 %v664_v44, %v1448_v0  ;;  %v666_v53 = vmul.f32 %v664_v44, %v1450_v1  ;;  %p1168_p12 = scmp.ne.s32.totalorder %s1590_s25, %s1167_s30 }
  0x9e   : > { %1058 = vpow2.f32 %v933_v38  ;;  %v648_v48 = vadd.f32 %v939_v42, %v634_v34  ;;  %v941_v51 = vrot.slane %v651_v47, 10  ;;  %v479_v54 = vadd.f32 1.0, %v1045_v40 }
  0x9f   : > { %v1049_v50 = vpop.eup %1048  ;;  %1060 = vrcp.f32 %v411_v36  ;;  %v942_v55 = vrot.slane %v652_v49, 10  ;;  %v480_v56 = vadd.f32 1.0, %v1047_v45  ;;  %v944_v58 = vrot.slane %v665_v52, 11  ;;  %p1169_p0 = pnand %p1168_p12, %p1383_p9 }
  0xa0   : > { %1062 = vrcp.f32 %v412_v41  ;;  %v661_v57 = vadd.f32 %v941_v51, %v647_v46  ;;  %v945_v59 = vrot.slane %v666_v53, 11  ;;  %v547_v61 = vadd.f32 1.0, %v1049_v50 }
  0xa1   : > { %v1051_v60 = vpop.eup %1050  ;;  %v662_v62 = vadd.f32 %v942_v55, %v648_v48  ;;  %1064 = vrcp.f32 %v479_v54  ;;  %v350_v5 = vstv %s1568_s11  ;;  %v286_v14 = vstv %s1573_s13  ;;  %p1170_p3 = pneg %p1169_p0  ;;  %s1171_s11 = sshll.u32 %s1248_s3, 4  ;;  %s1172_s11 = int_to_ptr.vmem [resolvable:$false] %s1171_s11 }
  0xa2   : > { %v1053_v63 = vpop.eup %1052  ;;  %v675_v2 = vadd.f32 %v944_v58, %v661_v57  ;;  %1066 = vrcp.f32 %v480_v56  ;;  %v548_v3 = vadd.f32 1.0, %v1051_v60  ;;  %v418_v16 = vstv %s1575_s14  ;;  %s1173_s13 = scalar_lea.vmem %s1172_s11, 128  ;;  %p1174_p2 = scmp.lt.s32.totalorder %s1590_s25, %s1172_s11 }
  0xa3   : > { %v1055_v0 = vpop.eup %1054  ;;  %v676_v1 = vadd.f32 %v945_v59, %v662_v62  ;;  %1068 = vrcp.f32 %v547_v61  ;;  %v351_v11 = vmul.f32 %v1053_v63, %v350_v5  ;;  %v486_v22 = vstv %s1578_s15  ;;  %p1175_p4 = scmp.lt.s32.totalorder %s1173_s13, %s1167_s30 }
  0xa4   : > { %v946_v4 = vmul.f32 -1.442695, %v675_v2  ;;  %v352_v15 = vmul.f32 %v1055_v0, %v350_v5  ;;  %v554_v31 = vstv %s920_s16  ;;  %v622_v40 = vstv %s934_s17 }
  0xa5   : > { %v947_v6 = vmul.f32 -1.442695, %v676_v1  ;;  %v353_v17 = vadd.f32 %v351_v11, %v286_v14  ;;  %v690_v46 = vstv %s948_s18  ;;  %v1247_v61 = vmov 1966171168   ;;  %p1176_p6 = por %p1175_p4, %p1174_p2 }
  0xa6   : > { %1070 = vpow2.f32 %v946_v4  ;;  %v354_v20 = vadd.f32 %v352_v15, %v286_v14  ;;  %v710_v62 = vunpack.c.l.s4 %v1247_v61  ;;  %v712_v63 = vlaneseq }
  0xa7   : > { %v1057_v7 = vpop.eup %1056  ;;  %1072 = vpow2.f32 %v947_v6  ;;  %p1177_p8 = pnand %p1176_p6, %p1170_p3 }
  0xa8   : > { %v1059_v8 = vpop.eup %1058  ;;  %v615_v9 = vadd.f32 1.0, %v1057_v7  ;;  %1074 = vrcp.f32 %v548_v3  ;;  %v711_v2 = vunpack.c.0.s8 %v710_v62  ;;  %v713_v0 = vshrl.u32 %v712_v63, 7 }
  0xa9   : > { %v1061_v10 = vpop.eup %1060  ;;  %v616_v12 = vadd.f32 1.0, %v1059_v8  ;;  %vm734_vm0 = vcmp.lt.s32.totalorder %v712_v63, 512 }
  0xaa   : > { %v1063_v13 = vpop.eup %1062  ;;  %1076 = vrcp.f32 %v615_v9  ;;  %v419_v18 = vmul.f32 %v1061_v10, %v418_v16  ;;  %v714_v1 = vsub.s32 %v711_v2, %v713_v0 }
  0xab   : > { %1078 = vrcp.f32 %v616_v12  ;;  %v1065_v19 = vpop.eup %1064  ;;  %v420_v21 = vmul.f32 %v1063_v13, %v418_v16 }
  0xac   : > { %v1067_v23 = vpop.eup %1066  ;;  %v421_v26 = vadd.f32 %v419_v18, %v353_v17  ;;  %v487_v27 = vmul.f32 %v1065_v19, %v486_v22 }
  0xad   : > { %v1069_v24 = vpop.eup %1068  ;;  %v422_v29 = vadd.f32 %v420_v21, %v354_v20  ;;  %v488_v30 = vmul.f32 %v1067_v23, %v486_v22 }
  0xae   : > { %v489_v35 = vadd.f32 %v487_v27, %v421_v26  ;;  %v555_v36 = vmul.f32 %v1069_v24, %v554_v31 }
  0xaf   : > { %v490_v38 = vadd.f32 %v488_v30, %v422_v29 }
  0xb0   : > { %v1071_v25 = vpop.eup %1070  ;;  %v557_v42 = vadd.f32 %v555_v36, %v489_v35 }
  0xb1   : > { %v1073_v28 = vpop.eup %1072  ;;  %v683_v32 = vadd.f32 1.0, %v1071_v25 }
  0xb2   : > { %v1075_v33 = vpop.eup %1074  ;;  %v684_v34 = vadd.f32 1.0, %v1073_v28 }
  0xb3   : > { %1080 = vrcp.f32 %v683_v32  ;;  %v556_v39 = vmul.f32 %v1075_v33, %v554_v31 }
  0xb4   : > { %1082 = vrcp.f32 %v684_v34  ;;  %v1077_v37 = vpop.eup %1076 }
  0xb5   : > { %v1079_v41 = vpop.eup %1078  ;;  %v623_v43 = vmul.f32 %v1077_v37, %v622_v40  ;;  %v558_v44 = vadd.f32 %v556_v39, %v490_v38 }
  0xb6   : > { %v624_v45 = vmul.f32 %v1079_v41, %v622_v40 }
  0xb7   : > { %v625_v47 = vadd.f32 %v623_v43, %v557_v42 }
  0xb8   : > { %v626_v49 = vadd.f32 %v624_v45, %v558_v44 }
  0xbd   : > { %v1081_v48 = vpop.eup %1080 }
  0xbe   : > { %v1083_v50 = vpop.eup %1082  ;;  %v691_v51 = vmul.f32 %v1081_v48, %v690_v46 }
  0xbf   : > { %v692_v52 = vmul.f32 %v1083_v50, %v690_v46 }
  0xc0   : > { %v693_v53 = vadd.f32 %v691_v51, %v625_v47 }
  0xc1   : > { %v694_v54 = vadd.f32 %v692_v52, %v626_v49 }
  0xc2   : > { %v949_v55 = vmul.f32 -1.442695, %v693_v53 }
  0xc3   : > { %v950_v56 = vmul.f32 -1.442695, %v694_v54 }
  0xc4   : > { %1084 = vpow2.f32 %v949_v55 }
  0xc5   : > { %1086 = vpow2.f32 %v950_v56 }
  0xce   : > { %v1085_v57 = vpop.eup %1084 }
  0xcf   : > { %v1087_v58 = vpop.eup %1086  ;;  %v701_v59 = vadd.f32 1.0, %v1085_v57 }
  0xd0   : > { %v702_v60 = vadd.f32 1.0, %v1087_v58 }
  0xd1   : > { %1088 = vrcp.f32 %v701_v59 }
  0xd2   : > { %1090 = vrcp.f32 %v702_v60 }
  0xdb   : > { %v1089_v3 = vpop.eup %1088 }
  0xdc   : > { %v1091_v4 = vpop.eup %1090  ;;  %v715_v5 = vrot.slane %v1089_v3, %v714_v1 }
  0xdd   : > { %v722_v6 = vrot.slane %v1091_v4, %v714_v1 }
  0xdf   : > { %v723_v7 = vcombine.low %v715_v5, %v722_v6 }
  0xe1   : > { %v730_v8 = vrot.slane %v723_v7, %v714_v1 }
  0xe3   : > { %736 = vst.msk [vmem:[%s280_s7] sm:$0xf] %vm734_vm0, %v730_v8 }
  0xe4   : > { %1180 = shalt.err (!%p1177_p8)
}
  0xe5   : > { %s1181_s12 = scalar_lea.hbm %s1588_s9, 64  ;;  %s1185_s16 = scalar_lea.hbm %s1637_s5, 128 }
  0xe6   : > { %p1182_p5 = scmp.ne.s32.totalorder %s1588_s9, %s1181_s12  ;;  %p1186_p7 = scmp.lt.u32.totalorder %s1588_s9, %s1637_s5 }
  0xe7   : > { %p1187_p10 = scmp.lt.u32.totalorder %s1185_s16, %s1181_s12  ;;  %p1189_p12 = scmp.lt.u32.totalorder %s1181_s12, %s1588_s9 }
  0xe8   : > { %p1183_p1 = pnand %p1182_p5, %p1383_p9 }
  0xe9   : > { %p1188_p11 = por %p1187_p10, %p1186_p7 }
  0xea   : > { %p1184_p13 = pneg %p1183_p1 }
  0xeb   : > { %p1190_p0 = por %p1189_p12, %p1188_p11 }
  0xed   : > { %p1191_p3 = pnand %p1190_p0, %p1184_p13 }
  0xef   : > { %1194 = shalt.err (!%p1191_p3)
}
  0xf0   : > { %972 = dma.vmem_to_hbm [thread:$0]  (%p1383_p9), %s1590_s25, 64, %s1588_s9, %s738_s10  }
  0xf1 PF: > { %s764_s24 = sand.u32 1, %s1229_s20   ;;  %p1654_p2 = scmp.ne.s32.totalorder %s1642_s26, 0 }
  0xf2   : > { %p1655_p4 = scmp.ge.s32.totalorder %s1241_s23, 2  ;;  %s765_s27 = scalar_lea.sflag [#allocation5], %s764_s24 }
  0xf4   : > { %p989_p6 = pnand %p1655_p4, %p1654_p2 }
  0xf6   : > { %1224 = dma.done.wait (!%p989_p6), %s765_s27, 64  }
  0xf7   : > { %1226 = vsyncadd (!%p989_p6), %s765_s27, 4294967232  ;;  %p21_p8 = scmp.ge.s32.totalorder %s1369_s19, 4   ;;  %s1656_s20 = smov %s1233_s21 }
  0xf8   : > { %s1657_s21 = smov %s1237_s22  ;;  %s1658_s22 = smov %s1379_s28 }
  0xf9   : > { %s1659_s23 = smov %s1369_s19  ;;  %23 = sbr.rel (!%p21_p8) target bundleno = 9 (0x9), region = 98 }
 0x100   :  { %770 = vsyncpa [#allocation4], 1 }
 0x101   :  { %772 = vsyncpa [#allocation4 + $0x1], 1 }
 0x102   :  { %773 = vsyncpa [#allocation5], 1 }
 0x103   :  { %775 = vsyncpa [#allocation5 + $0x1], 1 }
 0x104   :  { %776 = vsyncpa [#allocation6], 1 }
 0x105   :  { %778 = vsyncpa [#allocation6 + $0x1], 1 }
 0x106   :  { %779 = vsyncpa [#allocation8], 1 }

</bundles_post_ra>
